<compile_context>
chip_gen: v6e
topology: v6e:2x2x1
jax: 0.10.0
libtpu: 0.0.40
codegen_flags: <defaults>
</compile_context>

<pallas_src>
import functools

import jax
import jax.numpy as jnp
from jax.experimental import pallas as pl
from jax.experimental.pallas import tpu as pltpu

_LANE = 128      # lane width (last dim)
_SUBLANE = 8     # f32 sublane (second-to-last dim)


def _round_up(n, m):
    return ((n + m - 1) // m) * m


def _pad2d(x, row_mult, col_mult):
    r, c = x.shape
    pr = _round_up(r, row_mult) - r
    pc = _round_up(c, col_mult) - c
    if pr == 0 and pc == 0:
        return x
    return jnp.pad(x, ((0, pr), (0, pc)))


_VMEM_BUDGET = []


def _vmem_budget_bytes():
    """~75% of this generation's physical VMEM (≈48 MiB v7x, ≈96 MiB v5e/v6e)."""
    if not _VMEM_BUDGET:
        try:
            cap = int(pltpu.get_tpu_info().vmem_capacity_bytes)
        except Exception:
            cap = 64 * 1024 * 1024          # conservative fallback
        _VMEM_BUDGET.append(max(cap * 3 // 4, 32 * 1024 * 1024))
    return _VMEM_BUDGET[0]


def _pick_tile_n(op_padded, target):
    """Largest lane-multiple tile width that divides op_padded (no masked edge
    tile / no extra column padding), fits `target`, and — when possible —
    leaves >= 2 grid steps so the 'parallel' axis can shard across v7x cores."""
    n = op_padded // _LANE
    divs = [d for d in range(1, n + 1) if n % d == 0]
    best = [d for d in divs if d * _LANE <= target and n // d >= 2]
    if not best:
        best = [d for d in divs if d * _LANE <= target]
    if not best:
        best = [1]
    return max(best) * _LANE


# ---------------- Kernel 1: h = tanh(x @ w1 + b1)  (tiny, one block) -------
def _prefix_hidden_kernel(x_ref, w1_ref, b1_ref, h_ref):
    x = x_ref[...].astype(w1_ref.dtype)
    acc = jnp.dot(x, w1_ref[...], preferred_element_type=jnp.float32)
    # Emit h directly in the streaming (w2) dtype -> no per-tile cast later.
    h_ref[...] = jnp.tanh(acc + b1_ref[...].astype(jnp.float32)).astype(h_ref.dtype)


# ---------------- Kernel 2: out_tile = h @ w2_tile + b2_tile ---------------
# Streams w2 over the output-feature axis; h is small and stays resident.
def _prefix_out_kernel(h_ref, w2_ref, b2_ref, o_ref):
    y = jnp.dot(h_ref[...], w2_ref[...], preferred_element_type=jnp.float32)
    o_ref[...] = (y + b2_ref[...].astype(jnp.float32)).astype(o_ref.dtype)


def prefix_mlp_padded(x, w1p, b1p, w2p, b2p, *, out_dim, tile_n=None):
    """(M, H) -> (M, out_dim) f32 via Linear -> Tanh -> Linear.

    Weights arrive PRE-PADDED (done once at init): w1p (Hp, Pp), b1p (1, Pp),
    w2p (Pp, Opp), b2p (1, Opp) with Hp/Pp/Opp multiples of 128.  Only the
    (small) activation x is padded here.  The second Linear streams w2 tiles
    over the output-feature axis with double-buffered DMA behind the MXU.
    """
    M, H = x.shape
    Hp, Pp = w1p.shape
    _, Opp = w2p.shape
    Mp = _round_up(M, _SUBLANE)

    xp = x if (Mp == M and Hp == H) else jnp.pad(x, ((0, Mp - M), (0, Hp - H)))

    budget = _vmem_budget_bytes()
    w_bytes = jnp.dtype(w2p.dtype).itemsize
    h_bytes = w_bytes                              # h is emitted in w2's dtype
    x_bytes = jnp.dtype(xp.dtype).itemsize

    # --- First Linear + Tanh: computed exactly once, single small block. ---
    need1 = 2 * (Mp * Hp * x_bytes + Hp * Pp * w_bytes + Pp * w_bytes
                 + Mp * Pp * h_bytes) + (2 << 20)
    vmem_limit1 = int(min(max(need1, 32 << 20), budget))

    h = pl.pallas_call(
        _prefix_hidden_kernel,
        out_shape=jax.ShapeDtypeStruct((Mp, Pp), w2p.dtype),
        grid_spec=pl.GridSpec(
            grid=(1,),
            in_specs=[
                pl.BlockSpec((Mp, Hp), lambda i: (0, 0)),
                pl.BlockSpec((Hp, Pp), lambda i: (0, 0)),
                pl.BlockSpec((1, Pp), lambda i: (0, 0)),
            ],
            out_specs=pl.BlockSpec((Mp, Pp), lambda i: (0, 0)),
        ),
        compiler_params=pltpu.CompilerParams(
            dimension_semantics=("arbitrary",),
            vmem_limit_bytes=vmem_limit1),
    )(xp, w1p, b1p)

    # --- Second Linear: stream w2 tiles over the output-feature axis. ---
    # Per-tn VMEM cost (double-buffered w2/out/b2 tiles) + resident h.
    per_tn = 2 * Pp * w_bytes + 2 * Mp * 4 + 2 * w_bytes
    fixed = 2 * Mp * Pp * h_bytes + (4 << 20)      # resident h + headroom
    max_tn = max(_LANE, (budget - fixed) // per_tn)
    target = tile_n if tile_n is not None else (16384 if w_bytes <= 2 else 8192)
    tn = _pick_tile_n(Opp, min(target, max_tn))    # Opp % tn == 0 by construction
    grid_n = Opp // tn

    vmem_limit2 = int(min(max(fixed + per_tn * tn, 32 << 20), budget))

    cost2 = pl.CostEstimate(
        flops=2 * Mp * Pp * Opp,
        transcendentals=0,
        bytes_accessed=int(Pp * Opp * w_bytes + Opp * w_bytes
                           + Mp * Opp * 4 + Mp * Pp * h_bytes),
    )

    out = pl.pallas_call(
        _prefix_out_kernel,
        out_shape=jax.ShapeDtypeStruct((Mp, Opp), jnp.float32),
        grid_spec=pl.GridSpec(
            grid=(grid_n,),
            in_specs=[
                pl.BlockSpec((Mp, Pp), lambda j: (0, 0)),   # h: resident
                pl.BlockSpec((Pp, tn), lambda j: (0, j)),   # w2: streamed
                pl.BlockSpec((1, tn), lambda j: (0, j)),    # b2: streamed
            ],
            out_specs=pl.BlockSpec((Mp, tn), lambda j: (0, j)),
        ),
        compiler_params=pltpu.CompilerParams(
            dimension_semantics=("parallel",),   # independent output tiles
            vmem_limit_bytes=vmem_limit2),
        cost_estimate=cost2,
    )(h, w2p, b2p)

    return out[:M, :out_dim]


@functools.partial(jax.jit, static_argnames=("hidden_size", "out_dim", "tile_n"))
def _projection_forward(prefix, embedding, w1p, b1p, w2p, b2p, *,
                        hidden_size, out_dim, tile_n):
    B, L = prefix.shape
    x2d = jnp.take(embedding, prefix, axis=0).reshape(B * L, hidden_size)
    y2d = prefix_mlp_padded(x2d, w1p, b1p, w2p, b2p,
                            out_dim=out_dim, tile_n=tile_n)
    return y2d.reshape(B, L, out_dim)


@jax.jit
def _embedding_forward(prefix, embedding):
    return jnp.take(embedding, prefix, axis=0)


class PrefixEncoder:
    """JAX/Pallas port of the PyTorch PrefixEncoder module."""

    def __init__(self, hidden_size, num_hidden_layers, num_tokens,
                 prefix_projection, prefix_hidden_size, key,
                 param_dtype=jnp.float32, tile_n=None):
        self.prefix_projection = prefix_projection
        self.hidden_size = hidden_size
        self.out_dim = num_hidden_layers * 2 * hidden_size
        self.tile_n = tile_n
        k = jax.random.split(key, 3)
        if prefix_projection:
            # Embedding(num_tokens, hidden_size)
            self.embedding = (jax.random.normal(k[0], (num_tokens, hidden_size),
                                                jnp.float32) * 0.02).astype(param_dtype)
            # Linear(hidden_size, prefix_hidden_size): stored as (in, out)
            self.w1 = (jax.random.normal(k[1], (hidden_size, prefix_hidden_size),
                                         jnp.float32) * 0.02).astype(param_dtype)
            self.b1 = jnp.zeros((prefix_hidden_size,), param_dtype)
            # Linear(prefix_hidden_size, 2*layers*hidden): stored as (in, out)
            self.w2 = (jax.random.normal(k[2], (prefix_hidden_size, self.out_dim),
                                         jnp.float32) * 0.02).astype(param_dtype)
            self.b2 = jnp.zeros((self.out_dim,), param_dtype)
            # Pre-pad ONCE at init -> no per-forward full HBM copy of w2.
            self.w1p = _pad2d(self.w1, _LANE, _LANE)
            self.b1p = _pad2d(self.b1.reshape(1, -1), 1, _LANE)
            self.w2p = _pad2d(self.w2, _LANE, _LANE)
            self.b2p = _pad2d(self.b2.reshape(1, -1), 1, _LANE)
        else:
            # Embedding(num_tokens, 2*layers*hidden)
            self.embedding = (jax.random.normal(k[0], (num_tokens, self.out_dim),
                                                jnp.float32) * 0.02).astype(param_dtype)

    def __call__(self, prefix):
        # prefix: (B, L) int32 token ids
        if self.prefix_projection:
            return _projection_forward(prefix, self.embedding,
                                       self.w1p, self.b1p, self.w2p, self.b2p,
                                       hidden_size=self.hidden_size,
                                       out_dim=self.out_dim,
                                       tile_n=self.tile_n)
        return _embedding_forward(prefix, self.embedding)


def _reference(enc, prefix):
    """Pure-JAX f32 reference of the forward pass for verification."""
    if enc.prefix_projection:
        t = jnp.take(enc.embedding, prefix, axis=0).astype(jnp.float32)
        h = jnp.tanh(t @ enc.w1.astype(jnp.float32) + enc.b1.astype(jnp.float32))
        return h @ enc.w2.astype(jnp.float32) + enc.b2.astype(jnp.float32)
    return jnp.take(enc.embedding, prefix, axis=0)


if __name__ == "__main__":
    key = jax.random.PRNGKey(0)
    kp, kq, kb, ki = jax.random.split(key, 4)

    # Small shapes consistent with the module's forward.
    batch = 2
    prefix_len = 8                 # M = B*L = 16
    hidden_size = 32
    num_hidden_layers = 4          # output feature dim O = 4*2*32 = 256
    num_tokens = 16
    prefix_hidden_size = 64        # stand-in for the PyTorch default 500

    # --- f32 params: exact check vs the f32 reference. ---
    enc = PrefixEncoder(hidden_size, num_hidden_layers, num_tokens,
                        prefix_projection=True,
                        prefix_hidden_size=prefix_hidden_size, key=kp)

    prefix = jax.random.randint(ki, (batch, prefix_len), 0, num_tokens,
                                dtype=jnp.int32)

    out = jax.block_until_ready(enc(prefix))
    assert out.shape == (batch, prefix_len, num_hidden_layers * 2 * hidden_size)
    ref = _reference(enc, prefix)
    assert jnp.allclose(out, ref, atol=1e-5, rtol=1e-5), "mismatch vs reference (f32)"

    # --- bf16 params (streamed-weight dtype -> half the HBM bytes on the hot
    #     loop); accumulation stays f32, so tolerance is only mildly loosened.
    enc_bf16 = PrefixEncoder(hidden_size, num_hidden_layers, num_tokens,
                             prefix_projection=True,
                             prefix_hidden_size=prefix_hidden_size, key=kb,
                             param_dtype=jnp.bfloat16)
    out_bf16 = jax.block_until_ready(enc_bf16(prefix))
    ref_bf16 = _reference(enc_bf16, prefix)
    assert out_bf16.shape == ref_bf16.shape
    assert jnp.allclose(out_bf16, ref_bf16, atol=1e-2, rtol=5e-2), \
        "mismatch vs reference (bf16)"

    # --- prefix_projection=False (pure embedding) path. ---
    enc2 = PrefixEncoder(hidden_size, num_hidden_layers, num_tokens,
                         prefix_projection=False,
                         prefix_hidden_size=prefix_hidden_size, key=kq)
    out2 = jax.block_until_ready(enc2(prefix))
    ref2 = _reference(enc2, prefix)
    assert out2.shape == (batch, prefix_len, num_hidden_layers * 2 * hidden_size)
    assert jnp.allclose(out2, ref2), "mismatch vs reference (embedding path)"

    print("KERNEL_OK")
</pallas_src>

<mosaic_0001>
module attributes {stable_mosaic.version = 11 : i64} {
  func.func @_prefix_hidden_kernel(%arg0: i32, %arg1: memref<16x128xf32, #tpu.memory_space<vmem>>, %arg2: memref<128x128xf32, #tpu.memory_space<vmem>>, %arg3: memref<1x128xf32, #tpu.memory_space<vmem>>, %arg4: memref<16x128xf32, #tpu.memory_space<vmem>>) attributes {dimension_semantics = [#tpu.dimension_semantics<arbitrary>], iteration_bounds = array<i64: 1>, scalar_prefetch = 0 : i64, scratch_operands = 0 : i64, tpu.core_type = #tpu.core_type<tc>, window_params = [{pipeline_mode = #tpu.pipeline_mode<synchronous>, transform_indices = @transform_0, window_bounds = array<i64: 16, 128>}, {pipeline_mode = #tpu.pipeline_mode<synchronous>, transform_indices = @transform_1, window_bounds = array<i64: 128, 128>}, {pipeline_mode = #tpu.pipeline_mode<synchronous>, transform_indices = @transform_2, window_bounds = array<i64: 1, 128>}, {pipeline_mode = #tpu.pipeline_mode<synchronous>, transform_indices = @transform_3, window_bounds = array<i64: 16, 128>}]} {
    %c0 = arith.constant 0 : index
    %c0_0 = arith.constant 0 : index
    %0 = vector.load %arg1[%c0, %c0_0] : memref<16x128xf32, #tpu.memory_space<vmem>>, vector<16x128xf32>
    %c0_1 = arith.constant 0 : index
    %c0_2 = arith.constant 0 : index
    %1 = vector.load %arg2[%c0_1, %c0_2] : memref<128x128xf32, #tpu.memory_space<vmem>>, vector<128x128xf32>
    %cst = arith.constant dense<0.000000e+00> : vector<16x128xf32>
    %2 = tpu.matmul %0, %1, %cst {dimension_numbers = #tpu.dot_dimension_numbers<[1], [0], [0], [1], [0, 0, 1, 1], [], []>} : vector<16x128xf32>, vector<128x128xf32>, vector<16x128xf32> -> vector<16x128xf32>
    %c0_3 = arith.constant 0 : index
    %c0_4 = arith.constant 0 : index
    %3 = vector.load %arg3[%c0_3, %c0_4] : memref<1x128xf32, #tpu.memory_space<vmem>>, vector<1x128xf32>
    %4 = vector.broadcast %3 : vector<1x128xf32> to vector<16x128xf32>
    %5 = arith.addf %2, %4 : vector<16x128xf32>
    %6 = math.tanh %5 : vector<16x128xf32>
    %c0_5 = arith.constant 0 : index
    %c0_6 = arith.constant 0 : index
    %7 = vector.load %arg4[%c0_5, %c0_6] : memref<16x128xf32, #tpu.memory_space<vmem>>, vector<16x128xf32>
    tpu.vector_store %arg4[%c0_5, %c0_6], %6 {strides = array<i32>} : memref<16x128xf32, #tpu.memory_space<vmem>>, vector<16x128xf32>,
    return
  }
  func.func @transform_0(%arg0: i32) -> (i32, i32) {
    %c0_i32 = arith.constant 0 : i32
    %c0_i32_0 = arith.constant 0 : i32
    %c0_i32_1 = arith.constant 0 : i32
    return %c0_i32, %c0_i32_0 : i32, i32
  }
  func.func @transform_1(%arg0: i32) -> (i32, i32) {
    %c0_i32 = arith.constant 0 : i32
    %c0_i32_0 = arith.constant 0 : i32
    %c0_i32_1 = arith.constant 0 : i32
    return %c0_i32, %c0_i32_0 : i32, i32
  }
  func.func @transform_2(%arg0: i32) -> (i32, i32) {
    %c0_i32 = arith.constant 0 : i32
    %c0_i32_0 = arith.constant 0 : i32
    %c0_i32_1 = arith.constant 0 : i32
    return %c0_i32, %c0_i32_0 : i32, i32
  }
  func.func @transform_3(%arg0: i32) -> (i32, i32) {
    %c0_i32 = arith.constant 0 : i32
    %c0_i32_0 = arith.constant 0 : i32
    %c0_i32_1 = arith.constant 0 : i32
    return %c0_i32, %c0_i32_0 : i32, i32
  }
}

module attributes {stable_mosaic.version = 11 : i64} {
  func.func @_prefix_out_kernel(%arg0: i32, %arg1: memref<16x128xf32, #tpu.memory_space<vmem>>, %arg2: memref<128x128xf32, #tpu.memory_space<vmem>>, %arg3: memref<1x128xf32, #tpu.memory_space<vmem>>, %arg4: memref<16x128xf32, #tpu.memory_space<vmem>>) attributes {dimension_semantics = [#tpu.dimension_semantics<parallel>], iteration_bounds = array<i64: 2>, scalar_prefetch = 0 : i64, scratch_operands = 0 : i64, tpu.core_type = #tpu.core_type<tc>, window_params = [{pipeline_mode = #tpu.pipeline_mode<synchronous>, transform_indices = @transform_0, window_bounds = array<i64: 16, 128>}, {transform_indices = @transform_1, window_bounds = array<i64: 128, 128>}, {transform_indices = @transform_2, window_bounds = array<i64: 1, 128>}, {transform_indices = @transform_3, window_bounds = array<i64: 16, 128>}]} {
    %c0 = arith.constant 0 : index
    %c0_0 = arith.constant 0 : index
    %0 = vector.load %arg1[%c0, %c0_0] : memref<16x128xf32, #tpu.memory_space<vmem>>, vector<16x128xf32>
    %c0_1 = arith.constant 0 : index
    %c0_2 = arith.constant 0 : index
    %1 = vector.load %arg2[%c0_1, %c0_2] : memref<128x128xf32, #tpu.memory_space<vmem>>, vector<128x128xf32>
    %cst = arith.constant dense<0.000000e+00> : vector<16x128xf32>
    %2 = tpu.matmul %0, %1, %cst {dimension_numbers = #tpu.dot_dimension_numbers<[1], [0], [0], [1], [0, 0, 1, 1], [], []>} : vector<16x128xf32>, vector<128x128xf32>, vector<16x128xf32> -> vector<16x128xf32>
    %c0_3 = arith.constant 0 : index
    %c0_4 = arith.constant 0 : index
    %3 = vector.load %arg3[%c0_3, %c0_4] : memref<1x128xf32, #tpu.memory_space<vmem>>, vector<1x128xf32>
    %4 = vector.broadcast %3 : vector<1x128xf32> to vector<16x128xf32>
    %5 = arith.addf %2, %4 : vector<16x128xf32>
    %c0_5 = arith.constant 0 : index
    %c0_6 = arith.constant 0 : index
    %6 = vector.load %arg4[%c0_5, %c0_6] : memref<16x128xf32, #tpu.memory_space<vmem>>, vector<16x128xf32>
    tpu.vector_store %arg4[%c0_5, %c0_6], %5 {strides = array<i32>} : memref<16x128xf32, #tpu.memory_space<vmem>>, vector<16x128xf32>,
    return
  }
  func.func @transform_0(%arg0: i32) -> (i32, i32) {
    %c0_i32 = arith.constant 0 : i32
    %c0_i32_0 = arith.constant 0 : i32
    %c0_i32_1 = arith.constant 0 : i32
    return %c0_i32, %c0_i32_0 : i32, i32
  }
  func.func @transform_1(%arg0: i32) -> (i32, i32) {
    %c0_i32 = arith.constant 0 : i32
    %c0_i32_0 = arith.constant 0 : i32
    return %c0_i32, %arg0 : i32, i32
  }
  func.func @transform_2(%arg0: i32) -> (i32, i32) {
    %c0_i32 = arith.constant 0 : i32
    %c0_i32_0 = arith.constant 0 : i32
    return %c0_i32, %arg0 : i32, i32
  }
  func.func @transform_3(%arg0: i32) -> (i32, i32) {
    %c0_i32 = arith.constant 0 : i32
    %c0_i32_0 = arith.constant 0 : i32
    return %c0_i32, %arg0 : i32, i32
  }
}

</mosaic_0001>

<bundles_post_ra>
// kernel: _projection_forward.3
= control target key start
LH: loop header
LB: loop body
LE: loop exit
PB: predicated region body
PF: predicated region fallthrough
CT: control target
= control target key end

     0   :  { %8 = vsyncpa [#allocation4], 0  ;;  %s822_s0 = inlined_call_operand.vmem [shape: f32[16,128], index: 0, kind: input, shape index: {}]   ;;  %s823_s1 = inlined_call_operand.vmem [shape: f32[128,256], index: 1, kind: input, shape index: {}]   ;;  %s824_s2 = inlined_call_operand.vmem [shape: f32[1,256], index: 2, kind: input, shape index: {}]   ;;  %s825_s3 = inlined_call_operand.hbm [shape: f32[16,256], index: 3, kind: output, shape index: {}]  }
   0x1   :  { %10 = vsyncpa [#allocation4 + $0x1], 0  ;;  %s664_s12 = smov 0   ;;  %s666_s13 = smov 0  }
   0x2   :  { %s668_s14 = smov 0   ;;  %s670_s15 = smov 0  }
   0x3 LB: > { %s685_s16 = sadd.s32 4294967295, %s638_s15   ;;  %s470_s17 = sadd.s32 4294967294, %s638_s15   ;;  %s638_s15 = sphi %s670_s15, %s831_s15   ;;  %s634_s14 = sphi %s668_s14, %s830_s14   ;;  %s630_s13 = sphi %s666_s13, %s829_s13   ;;  %s626_s12 = sphi %s664_s12, %s828_s12  }
   0x4   : > { %s689_s18 = sadd.s32 1, %s638_s15   ;;  %s44_s19 = sadd.s32 1, %s634_s14 }
   0x5   : > { %s41_s20 = ssub.s32 %s638_s15, %s689_s18  ;;  %p51_p0 = scmp.ne.s32.totalorder %s634_s14, %s630_s13 }
   0x6   : > { %p42_p1 = scmp.eq.s32.totalorder %s41_s20, 0  ;;  %p52_p2 = scmp.eq.s32.totalorder %s638_s15, 0 }
   0x7   : > { %p107_p3 = scmp.eq.s32.totalorder %s685_s16, 1  ;;  %p112_p4 = scmp.ne.s32.totalorder %s630_s13, %s626_s12 }
   0x8   : > { %s701_s21 = scalar_select %p42_p1, %s634_s14, %s44_s19  }
   0x9   : > { %p53_p5 = por %p52_p2, %p51_p0  ;;  %p703_p6 = por %p107_p3, %p51_p0 }
   0xa   : > { %p113_p7 = scmp.eq.s32.totalorder %s470_s17, 1  ;;  %p472_p9 = scmp.ge.s32.totalorder %s638_s15, 2 }
   0xc   : > { %p707_p8 = por %p113_p7, %p112_p4  ;;  %132 = sbr.rel (%p472_p9) target bundleno = 29 (0x1d), region = 20 }
  0x11   : > { %135 = sbr.rel (!%p53_p5) target bundleno = 29 (0x1d), region = 24  ;;  %s137_s24 = sand.u32 (%p53_p5), 1, %s634_s14  }
  0x12   : > { %s474_s25 = sshll.u32 (%p53_p5), %s638_s15, 3  ;;  %s473_s26 = sshll.u32 (%p53_p5), %s137_s24, 7 }
  0x13   : > { %s719_s29 = scalar_lea.vmem (%p53_p5), %s823_s1, %s474_s25  ;;  %s139_s30 = scalar_lea.vmem (%p53_p5), [#allocation2], %s473_s26 }
  0x14   : > { %v200_v0 = vld [vmem:[%s719_s29] sm:$0xff] (%p53_p5)  ;;  %v202_v1 = vld [vmem:[%s719_s29 + $0x10] sm:$0xff] (%p53_p5) }
  0x15   : > { %v204_v2 = vld [vmem:[%s719_s29 + $0x20] sm:$0xff] (%p53_p5)  ;;  %201 = vst [vmem:[%s139_s30] sm:$0xff] (%p53_p5), %v200_v0  ;;  %203 = vst [vmem:[%s139_s30 + $0x8] sm:$0xff] (%p53_p5), %v202_v1  ;;  %v206_v3 = vld [vmem:[%s719_s29 + $0x30] sm:$0xff] (%p53_p5) }
  0x16   : > { %205 = vst [vmem:[%s139_s30 + $0x10] sm:$0xff] %v204_v2  ;;  %v208_v4 = vld [vmem:[%s719_s29 + $0x40] sm:$0xff]  ;;  %v210_v5 = vld [vmem:[%s719_s29 + $0x50] sm:$0xff]  ;;  %207 = vst [vmem:[%s139_s30 + $0x18] sm:$0xff] %v206_v3 }
  0x17   : > { %209 = vst [vmem:[%s139_s30 + $0x20] sm:$0xff] %v208_v4  ;;  %211 = vst [vmem:[%s139_s30 + $0x28] sm:$0xff] %v210_v5  ;;  %v212_v6 = vld [vmem:[%s719_s29 + $0x60] sm:$0xff]  ;;  %v214_v7 = vld [vmem:[%s719_s29 + $0x70] sm:$0xff] }
  0x18   : > { %v216_v8 = vld [vmem:[%s719_s29 + $0x80] sm:$0xff]  ;;  %213 = vst [vmem:[%s139_s30 + $0x30] sm:$0xff] %v212_v6  ;;  %215 = vst [vmem:[%s139_s30 + $0x38] sm:$0xff] %v214_v7  ;;  %v218_v9 = vld [vmem:[%s719_s29 + $0x90] sm:$0xff] }
  0x19   : > { %217 = vst [vmem:[%s139_s30 + $0x40] sm:$0xff] %v216_v8  ;;  %v220_v10 = vld [vmem:[%s719_s29 + $0xa0] sm:$0xff]  ;;  %v222_v11 = vld [vmem:[%s719_s29 + $0xb0] sm:$0xff]  ;;  %219 = vst [vmem:[%s139_s30 + $0x48] sm:$0xff] %v218_v9 }
  0x1a   : > { %221 = vst [vmem:[%s139_s30 + $0x50] sm:$0xff] %v220_v10  ;;  %223 = vst [vmem:[%s139_s30 + $0x58] sm:$0xff] %v222_v11  ;;  %v224_v12 = vld [vmem:[%s719_s29 + $0xc0] sm:$0xff]  ;;  %v226_v13 = vld [vmem:[%s719_s29 + $0xd0] sm:$0xff] }
  0x1b   : > { %v228_v14 = vld [vmem:[%s719_s29 + $0xe0] sm:$0xff]  ;;  %225 = vst [vmem:[%s139_s30 + $0x60] sm:$0xff] %v224_v12  ;;  %227 = vst [vmem:[%s139_s30 + $0x68] sm:$0xff] %v226_v13  ;;  %v230_v15 = vld [vmem:[%s719_s29 + $0xf0] sm:$0xff] }
  0x1c   : > { %229 = vst [vmem:[%s139_s30 + $0x70] sm:$0xff] %v228_v14  ;;  %231 = vst [vmem:[%s139_s30 + $0x78] sm:$0xff] %v230_v15 }
  0x1d PF: > { %p475_p10 = scmp.ge.s32.totalorder %s638_s15, 1  ;;  %p242_p11 = scmp.lt.s32.totalorder %s638_s15, 3 }
  0x1f   : > { %p243_p12 = pnand %p475_p10, %p242_p11 }
  0x20   : > { %s740_s4 = sand.u32 (!%p243_p12), 1, %s630_s13   ;;  %p275_p13 = scmp.lt.s32.totalorder (!%p243_p12), %s685_s16, 1 }
  0x21   : > { %246 = sbr.rel (%p243_p12) target bundleno = 283 (0x11b), region = 66  ;;  %s476_s7 = sshll.u32 (!%p243_p12), %s740_s4, 7 }
  0x22   : > { %s746_s8 = scalar_lea.vmem (!%p243_p12), [#allocation2], %s476_s7  ;;  %s477_s17 = sshll.u32 (!%p243_p12), %s740_s4, 4 }
  0x23   : > { %s274_s25 = scalar_lea.vmem (!%p243_p12), [#allocation3], %s477_s17  ;;  %s480_s27 = sshll.u32 (!%p243_p12), %s685_s16, 7 }
  0x24   : > { %s393_s26 = sshll.u32 (!%p243_p12), %s274_s25, 4  ;;  %s779_s30 = scalar_lea.hbm (!%p243_p12), %s825_s3, %s480_s27  ;;  %s774_s26 = int_to_ptr.vmem [resolvable:$true] %s393_s26 }
  0x25   : > { %s381_s5 = scalar_lea.sflag (!%p243_p12), [#allocation4], %s740_s4  ;;  %s578_s6 = scalar_lea.vmem (!%p243_p12), %s774_s26, 256 }
  0x26   : > { %v278_v16 = vld [vmem:[%s822_s0] sm:$0xff]  ;;  %v295_v17 = vld [vmem:[%s746_s8 + $0x78] sm:$0xff]  ;;  %v294_v18 = vld [vmem:[%s746_s8 + $0x70] sm:$0xff]  ;;  %s276_s11 = scalar_select %p275_p13, %s685_s16, 1 }
  0x27   : > { %533 = vmatprep.mubr.f32.mxu0 %v278_v16  ;;  %501 = vmatprep.subr.mxu0 %v295_v17  ;;  %v293_v19 = vld [vmem:[%s746_s8 + $0x68] sm:$0xff]  ;;  %v292_v20 = vld [vmem:[%s746_s8 + $0x60] sm:$0xff]  ;;  %v291_v21 = vld [vmem:[%s746_s8 + $0x58] sm:$0xff]  ;;  %p579_p0 = scmp.ne.s32.totalorder %s774_s26, %s578_s6  ;;  %s640_s16 = smov [#allocation3]  }
  0x28   : > { %502 = vmatpush3.msra.mxu0 %v295_v17  ;;  %v290_v22 = vld [vmem:[%s746_s8 + $0x50] sm:$0xff]  ;;  %v289_v23 = vld [vmem:[%s746_s8 + $0x48] sm:$0xff]  ;;  %v288_v24 = vld [vmem:[%s746_s8 + $0x40] sm:$0xff]  ;;  %s277_s24 = scalar_lea.vmem %s824_s2, %s276_s11  ;;  %s582_s7 = sshll.u32 %s640_s16, 4  ;;  %s583_s7 = int_to_ptr.vmem [resolvable:$false] %s582_s7 }
  0x29   : > { %503 = vmatprep.subr.mxu0 %v294_v18  ;;  %v287_v25 = vld [vmem:[%s746_s8 + $0x38] sm:$0xff]  ;;  %v286_v26 = vld [vmem:[%s746_s8 + $0x30] sm:$0xff]  ;;  %v285_v27 = vld [vmem:[%s746_s8 + $0x28] sm:$0xff]  ;;  %p580_p1 = pnand %p579_p0, %p703_p6  ;;  %p585_p3 = scmp.lt.s32.totalorder %s774_s26, %s583_s7 }
  0x2a   : > { %504 = vmatpush3.msra.mxu0 %v294_v18  ;;  %v284_v28 = vld [vmem:[%s746_s8 + $0x20] sm:$0xff]  ;;  %v283_v29 = vld [vmem:[%s746_s8 + $0x18] sm:$0xff]  ;;  %v282_v30 = vld [vmem:[%s746_s8 + $0x10] sm:$0xff] }
  0x2b   : > { %505 = vmatprep.subr.mxu0 %v293_v19  ;;  %v281_v31 = vld [vmem:[%s746_s8 + $0x8] sm:$0xff]  ;;  %v280_v32 = vld [vmem:[%s746_s8] sm:$0xff]  ;;  %p581_p2 = pneg %p580_p1  ;;  %s584_s8 = scalar_lea.vmem %s583_s7, 512 }
  0x2c   : > { %506 = vmatpush3.msra.mxu0 %v293_v19  ;;  %v279_v33 = vld [vmem:[%s822_s0 + $0x8] sm:$0xff]  ;;  %v478_v34 = vld [vmem:[%s277_s24] ss:$0 sm:$0xff]  ;;  %p586_p4 = scmp.lt.s32.totalorder %s584_s8, %s578_s6 }
  0x2d   : > { %507 = vmatprep.subr.mxu0 %v292_v20 }
  0x2e   : > { %508 = vmatpush3.msra.mxu0 %v292_v20  ;;  %p587_p5 = por %p586_p4, %p585_p3 }
  0x2f   : > { %509 = vmatprep.subr.mxu0 %v291_v21 }
  0x30   : > { %510 = vmatpush3.msra.mxu0 %v291_v21  ;;  %p588_p7 = pnand %p587_p5, %p581_p2 }
  0x31   : > { %511 = vmatprep.subr.mxu0 %v290_v22 }
  0x32   : > { %512 = vmatpush3.msra.mxu0 %v290_v22 }
  0x33   : > { %513 = vmatprep.subr.mxu0 %v289_v23 }
  0x34   : > { %514 = vmatpush3.msra.mxu0 %v289_v23 }
  0x35   : > { %515 = vmatprep.subr.mxu0 %v288_v24 }
  0x36   : > { %516 = vmatpush3.msra.mxu0 %v288_v24 }
  0x37   : > { %517 = vmatprep.subr.mxu0 %v287_v25 }
  0x38   : > { %518 = vmatpush3.msra.mxu0 %v287_v25 }
  0x39   : > { %519 = vmatprep.subr.mxu0 %v286_v26 }
  0x3a   : > { %520 = vmatpush3.msra.mxu0 %v286_v26 }
  0x3b   : > { %521 = vmatprep.subr.mxu0 %v285_v27 }
  0x3c   : > { %522 = vmatpush3.msra.mxu0 %v285_v27 }
  0x3d   : > { %523 = vmatprep.subr.mxu0 %v284_v28 }
  0x3e   : > { %524 = vmatpush3.msra.mxu0 %v284_v28 }
  0x3f   : > { %525 = vmatprep.subr.mxu0 %v283_v29 }
  0x40   : > { %526 = vmatpush3.msra.mxu0 %v283_v29 }
  0x41   : > { %527 = vmatprep.subr.mxu0 %v282_v30 }
  0x42   : > { %528 = vmatpush3.msra.mxu0 %v282_v30 }
  0x43   : > { %529 = vmatprep.subr.mxu0 %v281_v31 }
  0x44   : > { %530 = vmatpush3.msra.mxu0 %v281_v31 }
  0x45   : > { %531 = vmatprep.subr.mxu0 %v280_v32 }
  0x46   : > { %532 = vmatpush3.msra.mxu0 %v280_v32 }
  0x47   : > { %534 = vmatmul.mubr.f32.vlgmr.msra.gmra.mxu0 %v279_v33 }
 0x107   : > { %v535_v35 = vpop.f32.mrf.mxu0 }
 0x108   : > { %v375_v36 = vadd.f32 %v535_v35, %v478_v34 }
 0x109   : > { %v369_v37 = vpop.f32.mrf.mxu0 }
 0x10a   : > { %379 = vst [vmem:[%s274_s25 + $0x8] sm:$0xff] %v375_v36  ;;  %v370_v38 = vadd.f32 %v478_v34, %v369_v37 }
 0x10c   : > { %378 = vst [vmem:[%s274_s25] sm:$0xff] %v370_v38 }
 0x10d   : > { %591 = shalt.err (!%p588_p7)
}
 0x10e   : > { %s592_s9 = scalar_lea.hbm %s779_s30, 256  ;;  %s596_s17 = scalar_lea.hbm %s825_s3, 512 }
 0x10f   : > { %p593_p10 = scmp.ne.s32.totalorder %s779_s30, %s592_s9  ;;  %p597_p13 = scmp.lt.s32.totalorder %s779_s30, %s825_s3 }
 0x110   : > { %p598_p0 = scmp.lt.s32.totalorder %s596_s17, %s592_s9 }
 0x111   : > { %p594_p11 = pnand %p593_p10, %p703_p6 }
 0x112   : > { %p599_p1 = por %p598_p0, %p597_p13 }
 0x113   : > { %p595_p12 = pneg %p594_p11 }
 0x115   : > { %p600_p2 = pnand %p599_p1, %p595_p12 }
 0x117   : > { %603 = shalt.err (!%p600_p2)
}
 0x118   : > { %s641_s24 = smov 128   ;;  %s642_s25 = smov 256  }
 0x119   : > { %s643_s27 = smov 8  }
 0x11a   : > { %536 = dma.vmem_to_hbm [thread:$0]  (%p703_p6), %s774_s26, 256, %s779_s30, %s381_s5, %s641_s24, %s642_s25, %s643_s27  }
 0x11b PF: > { %s408_s28 = sand.u32 1, %s626_s12   ;;  %p539_p3 = pnand %p472_p9, %p707_p8 }
 0x11c   : > { %s409_s29 = scalar_lea.sflag [#allocation4], %s408_s28 }
 0x11d   : > { %p540_p4 = pneg %p539_p3 }
 0x11f   : > { %621 = dma.done.wait (%p540_p4), %s409_s29, 256  }
 0x120   : > { %623 = vsyncadd (%p540_p4), %s409_s29, 4294967040  ;;  %p13_p5 = scmp.ge.s32.totalorder %s689_s18, 4   ;;  %s828_s12 = smov %s630_s13 }
 0x121   : > { %s829_s13 = smov %s634_s14  ;;  %s830_s14 = smov %s701_s21 }
 0x122   : > { %s831_s15 = smov %s689_s18  ;;  %15 = sbr.rel (!%p13_p5) target bundleno = 3 (0x3), region = 113 }
 0x127   :  { %414 = vsyncpa [#allocation4], 1 }
 0x128   :  { %416 = vsyncpa [#allocation4 + $0x1], 1 }

// kernel: _projection_forward.2
= control target key start
LH: loop header
LB: loop body
LE: loop exit
PB: predicated region body
PF: predicated region fallthrough
CT: control target
= control target key end

     0   :  { %8 = vsyncpa [#allocation3], 0  ;;  %s298_s0 = inlined_call_operand.vmem [shape: f32[16,128], index: 0, kind: input, shape index: {}]   ;;  %s299_s1 = inlined_call_operand.hbm [shape: f32[128,128], index: 1, kind: input, shape index: {}]   ;;  %s300_s2 = inlined_call_operand.hbm [shape: f32[1,128], index: 2, kind: input, shape index: {}]   ;;  %s301_s3 = inlined_call_operand.vmem [shape: f32[16,128], index: 3, kind: output, shape index: {}]  }
   0x1   :  { %9 = vsyncpa [#allocation5], 0  ;;  %s256_s12 = smov [#allocation2]  }
   0x2   :  { %s17_s13 = sshll.u32 %s256_s12, 4  ;;  %s18_s13 = int_to_ptr.vmem [resolvable:$true] %s17_s13 }
   0x3   :  { %s220_s14 = scalar_lea.vmem %s18_s13, 2048  ;;  %p225_p1 = scmp.lt.s32.totalorder %s18_s13, %s18_s13 }
   0x4   :  { %p221_p0 = scmp.ne.s32.totalorder %s18_s13, %s220_s14  ;;  %p226_p2 = scmp.lt.s32.totalorder %s220_s14, %s220_s14 }
   0x6   :  { %p227_p3 = por %p226_p2, %p225_p1 }
   0x8   :  { %p228_p4 = pnand %p227_p3, %p221_p0 }
   0xa   :  { %231 = shalt.err (!%p228_p4)
}
   0xb   :  { %s257_s15 = smov 128   ;;  %s258_s16 = smov 8  }
   0xc   :  { %23 = dma.hbm_to_vmem [thread:$0]  %s299_s1, 2048, %s18_s13, [#allocation3], %s257_s15, %s257_s15, %s258_s16  }
   0xd   :  { %s259_s19 = smov [#allocation4]  }
   0xe   :  { %s30_s20 = sshll.u32 %s259_s19, 4  ;;  %s31_s20 = int_to_ptr.vmem [resolvable:$true] %s30_s20 }
   0xf   :  { %s240_s21 = scalar_lea.vmem %s31_s20, 16  ;;  %s244_s22 = scalar_lea.vmem %s31_s20, 32 }
  0x10   :  { %p241_p5 = scmp.ne.s32.totalorder %s31_s20, %s240_s21  ;;  %p245_p6 = scmp.lt.s32.totalorder %s31_s20, %s31_s20 }
  0x11   :  { %p246_p7 = scmp.lt.s32.totalorder %s244_s22, %s240_s21 }
  0x13   :  { %p247_p8 = por %p246_p7, %p245_p6 }
  0x15   :  { %p248_p9 = pnand %p247_p8, %p241_p5 }
  0x17   :  { %251 = shalt.err (!%p248_p9)
}
  0x18   :  { %33 = dma.hbm_to_vmem [thread:$0]  %s300_s2, 16, %s31_s20, [#allocation5]  }
  0x19   :  { %252 = dma.done.wait [#allocation3], 2048  }
  0x1a   :  { %253 = vsyncadd [#allocation3], 4294965248 }
  0x1b   :  { %254 = dma.done.wait [#allocation5], 16  }
  0x1c   :  { %255 = vsyncadd [#allocation5], 4294967280  ;;  %v57_v0 = vld [vmem:[#allocation2 + $0x78] sm:$0xff]  ;;  %v56_v1 = vld [vmem:[#allocation2 + $0x70] sm:$0xff] }
  0x1d   :  { %169 = vmatprep.subr.mxu0 %v57_v0  ;;  %v55_v2 = vld [vmem:[#allocation2 + $0x68] sm:$0xff]  ;;  %v54_v3 = vld [vmem:[#allocation2 + $0x60] sm:$0xff]  ;;  %v53_v5 = vld [vmem:[#allocation2 + $0x58] sm:$0xff] }
  0x1e   :  { %170 = vmatpush3.msra.mxu0 %v57_v0  ;;  %v40_v4 = vld [vmem:[%s298_s0] sm:$0xff]  ;;  %v52_v6 = vld [vmem:[#allocation2 + $0x50] sm:$0xff]  ;;  %v51_v7 = vld [vmem:[#allocation2 + $0x48] sm:$0xff] }
  0x1f   :  { %171 = vmatprep.subr.mxu0 %v56_v1  ;;  %201 = vmatprep.mubr.f32.mxu0 %v40_v4  ;;  %v50_v8 = vld [vmem:[#allocation2 + $0x40] sm:$0xff]  ;;  %v49_v9 = vld [vmem:[#allocation2 + $0x38] sm:$0xff]  ;;  %v48_v10 = vld [vmem:[#allocation2 + $0x30] sm:$0xff] }
  0x20   :  { %172 = vmatpush3.msra.mxu0 %v56_v1  ;;  %v47_v11 = vld [vmem:[#allocation2 + $0x28] sm:$0xff]  ;;  %v46_v12 = vld [vmem:[#allocation2 + $0x20] sm:$0xff]  ;;  %v45_v13 = vld [vmem:[#allocation2 + $0x18] sm:$0xff] }
  0x21   :  { %173 = vmatprep.subr.mxu0 %v55_v2  ;;  %v44_v14 = vld [vmem:[#allocation2 + $0x10] sm:$0xff]  ;;  %v43_v15 = vld [vmem:[#allocation2 + $0x8] sm:$0xff]  ;;  %v42_v16 = vld [vmem:[#allocation2] sm:$0xff] }
  0x22   :  { %174 = vmatpush3.msra.mxu0 %v55_v2  ;;  %v41_v17 = vld [vmem:[%s298_s0 + $0x8] sm:$0xff]  ;;  %v150_v18 = vld [vmem:[#allocation4] ss:$0 sm:$0xff] }
  0x23   :  { %175 = vmatprep.subr.mxu0 %v54_v3 }
  0x24   :  { %176 = vmatpush3.msra.mxu0 %v54_v3 }
  0x25   :  { %177 = vmatprep.subr.mxu0 %v53_v5 }
  0x26   :  { %178 = vmatpush3.msra.mxu0 %v53_v5 }
  0x27   :  { %179 = vmatprep.subr.mxu0 %v52_v6 }
  0x28   :  { %180 = vmatpush3.msra.mxu0 %v52_v6 }
  0x29   :  { %181 = vmatprep.subr.mxu0 %v51_v7 }
  0x2a   :  { %182 = vmatpush3.msra.mxu0 %v51_v7 }
  0x2b   :  { %183 = vmatprep.subr.mxu0 %v50_v8 }
  0x2c   :  { %184 = vmatpush3.msra.mxu0 %v50_v8 }
  0x2d   :  { %185 = vmatprep.subr.mxu0 %v49_v9 }
  0x2e   :  { %186 = vmatpush3.msra.mxu0 %v49_v9 }
  0x2f   :  { %187 = vmatprep.subr.mxu0 %v48_v10 }
  0x30   :  { %188 = vmatpush3.msra.mxu0 %v48_v10 }
  0x31   :  { %189 = vmatprep.subr.mxu0 %v47_v11 }
  0x32   :  { %190 = vmatpush3.msra.mxu0 %v47_v11 }
  0x33   :  { %191 = vmatprep.subr.mxu0 %v46_v12 }
  0x34   :  { %192 = vmatpush3.msra.mxu0 %v46_v12 }
  0x35   :  { %193 = vmatprep.subr.mxu0 %v45_v13 }
  0x36   :  { %194 = vmatpush3.msra.mxu0 %v45_v13 }
  0x37   :  { %195 = vmatprep.subr.mxu0 %v44_v14 }
  0x38   :  { %196 = vmatpush3.msra.mxu0 %v44_v14 }
  0x39   :  { %197 = vmatprep.subr.mxu0 %v43_v15 }
  0x3a   :  { %198 = vmatpush3.msra.mxu0 %v43_v15 }
  0x3b   :  { %199 = vmatprep.subr.mxu0 %v42_v16 }
  0x3c   :  { %200 = vmatpush3.msra.mxu0 %v42_v16 }
  0x3d   :  { %202 = vmatmul.mubr.f32.vlgmr.msra.gmra.mxu0 %v41_v17 }
  0xfd   :  { %v203_v19 = vpop.f32.mrf.mxu0 }
  0xfe   :  { %v137_v20 = vadd.f32 %v203_v19, %v150_v18 }
  0xff   :  { %v131_v21 = vpop.f32.mrf.mxu0 }
 0x100   :  { %208 = vtanh.f32 %v137_v20  ;;  %v132_v22 = vadd.f32 %v150_v18, %v131_v21 }
 0x102   :  { %210 = vtanh.f32 %v132_v22 }
 0x10d   :  { %v209_v23 = vpop.eup %208 }
 0x10e   :  { %143 = vst [vmem:[%s301_s3 + $0x8] sm:$0xff] %v209_v23 }
 0x10f   :  { %v211_v24 = vpop.eup %210 }
 0x110   :  { %142 = vst [vmem:[%s301_s3] sm:$0xff] %v211_v24 }
 0x111   :  { %148 = vsyncpa [#allocation3], 1 }
 0x112   :  { %149 = vsyncpa [#allocation5], 1 }

</bundles_post_ra>
